<compile_context>
chip_gen: v5e
topology: v5e:2x2
jax: 0.10.0
libtpu: 0.0.40
codegen_flags: <defaults>
</compile_context>

<pallas_src>
import numpy as np
import jax
import jax.numpy as jnp
from jax.experimental import pallas as pl
from jax.experimental.pallas import tpu as pltpu


# --------------------------- Pallas kernel ----------------------------------

def _outconv_kernel(x_ref, w_ref, b_ref, o_ref):
    # x_ref: (Cin, T)    one lane-dense spatial tile (T = chunk of H*W)
    # w_ref: (Cout, Cin) 1x1 conv weight (PyTorch layout, squeezed), resident
    # b_ref: (Cout, 1)   bias, broadcast over the spatial lanes
    # o_ref: (Cout, T)
    y = jnp.dot(w_ref[...], x_ref[...], preferred_element_type=jnp.float32)
    o_ref[...] = (y + b_ref[...]).astype(o_ref.dtype)


# --------------------------- tiling / VMEM policy ----------------------------

def _round_down_128(v):
    return (v // 128) * 128


def _vmem_limit_bytes():
    """Scoped-VMEM limit: ~48 MiB on v7x (64 MiB VMEM), ~96 MiB on v5e/v6e (128 MiB)."""
    try:
        cap = int(pltpu.get_tpu_info().vmem_capacity_bytes)
    except Exception:
        cap = 64 << 20                      # conservative fallback (v7x per-TC VMEM)
    return min(3 * cap // 4, 96 << 20)


def _choose_spatial_tile(P, N, cin_bytes_per_col, cout_bytes_per_col,
                         block_budget_bytes, target_block_bytes):
    """Pick a 128-aligned spatial tile T.

    Targets a multi-MiB input block (HBM-bound kernel), caps the double-buffered
    input+output working set to the VMEM budget, and guarantees >=2 total grid
    steps so v7x's two TensorCores both get work.
    """
    if P <= 128:
        return P                            # full (small) extent; allowed as-is
    p_floor = max(128, _round_down_128(P))  # no tile larger than the extent
    t_target = max(128, _round_down_128(target_block_bytes // cin_bytes_per_col))
    per_col = 2 * (cin_bytes_per_col + cout_bytes_per_col)   # double-buffered in+out
    t_vmem = max(128, _round_down_128(block_budget_bytes // per_col))
    T = min(t_target, t_vmem, p_floor)
    # v7x megacore: ensure the grid has at least 2 steps to shard across cores.
    if N * pl.cdiv(P, T) < 2 and T > 128:
        T = max(128, _round_down_128(T // 2))
    return T


# --------------------------- wrapper ------------------------------------------

def outconv_forward(x_nchw, w, b, *, compute_dtype=None, target_block_bytes=4 << 20):
    """1x1 conv (+bias), NCHW in / NCHW out — matches nn.Conv2d(in_ch, out_ch, 1).

    compute_dtype=jnp.bfloat16 halves HBM read bytes (accumulation stays f32).
    """
    if w.ndim == 4:                           # accept PyTorch (Cout, Cin, 1, 1) weights
        w = w.reshape(w.shape[0], w.shape[1])
    N, Cin, H, W = x_nchw.shape
    Cout = w.shape[0]
    P = H * W

    x3 = x_nchw.reshape(N, Cin, P)            # contiguous reshape: no data movement
    if compute_dtype is not None:
        x3 = x3.astype(compute_dtype)
        w = w.astype(compute_dtype)

    in_itemsize = x3.dtype.itemsize
    out_itemsize = 4                           # f32 output

    vmem_limit = _vmem_limit_bytes()
    block_budget = int(vmem_limit * 0.85)      # headroom for weight/bias/compiler scratch

    T = _choose_spatial_tile(P, N,
                             Cin * in_itemsize, Cout * out_itemsize,
                             block_budget, target_block_bytes)
    grid = (N, pl.cdiv(P, T))                  # masked partial last tile if 128 ∤ P

    cost = pl.CostEstimate(
        flops=int(2 * N * Cout * Cin * P),
        transcendentals=0,
        bytes_accessed=int(x3.size * in_itemsize + N * Cout * P * out_itemsize
                           + w.size * w.dtype.itemsize + b.size * 4),
    )

    out = pl.pallas_call(
        _outconv_kernel,
        out_shape=jax.ShapeDtypeStruct((N, Cout, P), jnp.float32),
        grid=grid,
        in_specs=[
            pl.BlockSpec((pl.Squeezed(), Cin, T), lambda n, s: (n, 0, s)),
            pl.BlockSpec((Cout, Cin), lambda n, s: (0, 0)),
            pl.BlockSpec((Cout, 1), lambda n, s: (0, 0)),
        ],
        out_specs=pl.BlockSpec((pl.Squeezed(), Cout, T), lambda n, s: (n, 0, s)),
        compiler_params=pltpu.CompilerParams(
            dimension_semantics=("parallel", "parallel"),
            vmem_limit_bytes=vmem_limit),
        cost_estimate=cost,
    )(x3, w, b.reshape(Cout, 1).astype(jnp.float32))

    return out.reshape(N, Cout, H, W)


# --------------------------- pure-JAX reference ------------------------------

def reference_forward(x_nchw, w, b):
    if w.ndim == 4:
        w = w.reshape(w.shape[0], w.shape[1])
    return jnp.einsum('oc,nchw->nohw', w, x_nchw) + b[None, :, None, None]


# --------------------------- main ---------------------------------------------

if __name__ == "__main__":
    key = jax.random.PRNGKey(0)
    kx, kw, kb = jax.random.split(key, 3)

    # Case 1: 128-aligned spatial extent (H*W = 1024).
    N, in_ch, H, W, out_ch = 2, 16, 32, 32, 4
    x = jax.random.normal(kx, (N, in_ch, H, W), jnp.float32)                # NCHW
    w = jax.random.normal(kw, (out_ch, in_ch, 1, 1), jnp.float32) / np.sqrt(in_ch)
    b = jax.random.normal(kb, (out_ch,), jnp.float32) * 0.05

    out = jax.block_until_ready(outconv_forward(x, w, b))
    ref = reference_forward(x, w, b)
    np.testing.assert_allclose(np.asarray(out), np.asarray(ref), rtol=2e-3, atol=2e-3)

    # Case 2: non-128-aligned H*W (20x20 = 400) exercises the cdiv / masked-tile path.
    k2x, k2w, k2b = jax.random.split(jax.random.PRNGKey(1), 3)
    N2, in2, H2, W2, out2 = 1, 4, 20, 20, 3
    x2 = jax.random.normal(k2x, (N2, in2, H2, W2), jnp.float32)
    w2 = jax.random.normal(k2w, (out2, in2), jnp.float32) / np.sqrt(in2)
    b2 = jax.random.normal(k2b, (out2,), jnp.float32) * 0.05

    out2_ = jax.block_until_ready(outconv_forward(x2, w2, b2))
    ref2 = reference_forward(x2, w2, b2)
    np.testing.assert_allclose(np.asarray(out2_), np.asarray(ref2), rtol=2e-3, atol=2e-3)

    print("KERNEL_OK")
</pallas_src>

<mosaic_0001>
module attributes {stable_mosaic.version = 11 : i64} {
  func.func @_outconv_kernel(%arg0: i32, %arg1: i32, %arg2: memref<1x16x1024xf32, #tpu.memory_space<vmem>>, %arg3: memref<4x16xf32, #tpu.memory_space<vmem>>, %arg4: memref<4x1xf32, #tpu.memory_space<vmem>>, %arg5: memref<1x4x1024xf32, #tpu.memory_space<vmem>>) attributes {dimension_semantics = [#tpu.dimension_semantics<parallel>, #tpu.dimension_semantics<parallel>], iteration_bounds = array<i64: 2, 1>, scalar_prefetch = 0 : i64, scratch_operands = 0 : i64, tpu.core_type = #tpu.core_type<tc>, window_params = [{transform_indices = @transform_0, window_bounds = array<i64: 1, 16, 1024>}, {pipeline_mode = #tpu.pipeline_mode<synchronous>, transform_indices = @transform_1, window_bounds = array<i64: 4, 16>}, {pipeline_mode = #tpu.pipeline_mode<synchronous>, transform_indices = @transform_2, window_bounds = array<i64: 4, 1>}, {transform_indices = @transform_3, window_bounds = array<i64: 1, 4, 1024>}]} {
    %c0 = arith.constant 0 : index
    %c0_0 = arith.constant 0 : index
    %0 = vector.load %arg3[%c0, %c0_0] : memref<4x16xf32, #tpu.memory_space<vmem>>, vector<4x16xf32>
    %c0_1 = arith.constant 0 : index
    %c0_2 = arith.constant 0 : index
    %c0_3 = arith.constant 0 : index
    %1 = vector.load %arg2[%c0_1, %c0_2, %c0_3] : memref<1x16x1024xf32, #tpu.memory_space<vmem>>, vector<1x16x1024xf32>
    %2 = vector.shape_cast %1 : vector<1x16x1024xf32> to vector<16x1024xf32>
    %cst = arith.constant dense<0.000000e+00> : vector<4x1024xf32>
    %3 = tpu.matmul %0, %2, %cst {dimension_numbers = #tpu.dot_dimension_numbers<[1], [0], [0], [1], [0, 0, 1, 1], [], []>} : vector<4x16xf32>, vector<16x1024xf32>, vector<4x1024xf32> -> vector<4x1024xf32>
    %c0_4 = arith.constant 0 : index
    %c0_5 = arith.constant 0 : index
    %4 = vector.load %arg4[%c0_4, %c0_5] : memref<4x1xf32, #tpu.memory_space<vmem>>, vector<4x1xf32>
    %5 = vector.broadcast %4 : vector<4x1xf32> to vector<4x1024xf32>
    %6 = arith.addf %3, %5 : vector<4x1024xf32>
    %c0_6 = arith.constant 0 : index
    %c0_7 = arith.constant 0 : index
    %c0_8 = arith.constant 0 : index
    %7 = vector.load %arg5[%c0_6, %c0_7, %c0_8] : memref<1x4x1024xf32, #tpu.memory_space<vmem>>, vector<1x4x1024xf32>
    %8 = vector.shape_cast %7 : vector<1x4x1024xf32> to vector<4x1024xf32>
    %9 = vector.shape_cast %6 : vector<4x1024xf32> to vector<1x4x1024xf32>
    tpu.vector_store %arg5[%c0_6, %c0_7, %c0_8], %9 {strides = array<i32>} : memref<1x4x1024xf32, #tpu.memory_space<vmem>>, vector<1x4x1024xf32>,
    return
  }
  func.func @transform_0(%arg0: i32, %arg1: i32) -> (i32, i32, i32) {
    %c0_i32 = arith.constant 0 : i32
    %c0_i32_0 = arith.constant 0 : i32
    return %arg0, %c0_i32, %arg1 : i32, i32, i32
  }
  func.func @transform_1(%arg0: i32, %arg1: i32) -> (i32, i32) {
    %c0_i32 = arith.constant 0 : i32
    %c0_i32_0 = arith.constant 0 : i32
    %c0_i32_1 = arith.constant 0 : i32
    return %c0_i32, %c0_i32_0 : i32, i32
  }
  func.func @transform_2(%arg0: i32, %arg1: i32) -> (i32, i32) {
    %c0_i32 = arith.constant 0 : i32
    %c0_i32_0 = arith.constant 0 : i32
    %c0_i32_1 = arith.constant 0 : i32
    return %c0_i32, %c0_i32_0 : i32, i32
  }
  func.func @transform_3(%arg0: i32, %arg1: i32) -> (i32, i32, i32) {
    %c0_i32 = arith.constant 0 : i32
    %c0_i32_0 = arith.constant 0 : i32
    return %arg0, %c0_i32, %arg1 : i32, i32, i32
  }
}

</mosaic_0001>

<bundles_post_ra>
// kernel: tpu_custom_call.1
= control target key start
LH: loop header
LB: loop body
LE: loop exit
PB: predicated region body
PF: predicated region fallthrough
CT: control target
= control target key end

     0   :  { %8 = vsyncpa [#allocation3], 0  ;;  %s911_s0 = inlined_call_operand.hbm [shape: f32[2,16,1024], index: 0, kind: input, shape index: {}]   ;;  %s912_s1 = inlined_call_operand.vmem [shape: f32[4,16], index: 1, kind: input, shape index: {}]   ;;  %s913_s2 = inlined_call_operand.vmem [shape: f32[4,1], index: 2, kind: input, shape index: {}]   ;;  %s914_s3 = inlined_call_operand.hbm [shape: f32[2,4,1024], index: 3, kind: output, shape index: {}]  }
   0x1   :  { %10 = vsyncpa [#allocation3 + $0x1], 0 }
   0x2   :  { %11 = vsyncpa [#allocation4], 0 }
   0x3   :  { %13 = vsyncpa [#allocation4 + $0x1], 0  ;;  %s754_s12 = smov 0   ;;  %s756_s13 = smov 0  }
   0x4   :  { %s758_s14 = smov 0   ;;  %s760_s15 = smov 0  }
   0x5   :  { %s762_s16 = smov 0   ;;  %s764_s17 = smov 0  }
   0x6 LB: > { %s526_s18 = sadd.s32 4294967295, %s729_s17   ;;  %s527_s19 = sadd.s32 4294967294, %s729_s17   ;;  %s729_s17 = sphi %s764_s17, %s19_s17   ;;  %s725_s16 = sphi %s762_s16, %s923_s16   ;;  %s721_s15 = sphi %s760_s15, %s922_s15   ;;  %s717_s14 = sphi %s758_s14, %s921_s14   ;;  %s713_s13 = sphi %s756_s13, %s920_s13   ;;  %s709_s12 = sphi %s754_s12, %s919_s12  }
   0x7   : > { %s31_s20 = sadd.s32 1, %s725_s16  ;;  %s40_s21 = sadd.s32 1, %s717_s14 }
   0x8   : > { %p33_p0 = scmp.ge.s32.totalorder %s31_s20, 2  ;;  %p47_p1 = scmp.ne.s32.totalorder %s717_s14, %s713_s13 }
   0x9   : > { %p48_p2 = scmp.eq.s32.totalorder %s729_s17, 0  ;;  %p53_p3 = scmp.ne.s32.totalorder %s713_s13, %s709_s12 }
   0xa   : > { %s925_s20 = smov (%p33_p0, %s31_s20), 0  ;;  %p54_p5 = scmp.eq.s32.totalorder %s526_s18, 0 }
   0xb   : > { %p795_p4 = por %p48_p2, %p47_p1  ;;  %s35_s23 = ssub.s32 %s725_s16, %s925_s20 }
   0xc   : > { %p121_p6 = scmp.eq.s32.totalorder %s526_s18, 1  ;;  %p38_p7 = scmp.eq.s32.totalorder %s35_s23, 0 }
   0xd   : > { %p801_p8 = por %p54_p5, %p53_p3  ;;  %p127_p10 = scmp.eq.s32.totalorder %s527_s19, 1 }
   0xe   : > { %p805_p9 = por %p121_p6, %p47_p1  ;;  %p529_p12 = scmp.ge.s32.totalorder %s729_s17, 2 }
   0xf   : > { %s810_s26 = scalar_select %p38_p7, %s717_s14, %s40_s21  }
  0x10   : > { %p812_p11 = por %p127_p10, %p53_p3  ;;  %p563_p13 = scmp.lt.s32.totalorder %s729_s17, 2 }
  0x11   : > { %s153_s28 = sand.u32 1, %s717_s14   ;;  %s549_s30 = sshll.u32 %s725_s16, 7 }
  0x12   : > { %s530_s29 = sshll.u32 %s153_s28, 7  ;;  %s164_s6 = scalar_lea.hbm %s911_s0, %s549_s30 }
  0x13   : > { %s157_s7 = scalar_lea.vmem [#allocation2], %s530_s29  ;;  %s165_s9 = sshll.u32 %s164_s6, 4  ;;  %s166_s9 = int_to_ptr.hbm [resolvable:$true] %s165_s9 }
  0x14   : > { %s167_s8 = sshll.u32 %s157_s7, 4  ;;  %p556_p0 = pnand %p563_p13, %p795_p4  ;;  %s168_s8 = int_to_ptr.vmem [resolvable:$true] %s167_s8 }
  0x15   : > { %p533_p1 = scmp.ge.s32.totalorder %s729_s17, 1  ;;  %s154_s10 = scalar_lea.sflag [#allocation3], %s153_s28 }
  0x16   : > { %s731_s11 = smov 1024   ;;  %s732_s18 = smov 64  }
  0x17   : > { %558 = dma.hbm_to_vmem [thread:$0]  (!%p556_p0), %s166_s9, 2048, %s168_s8, %s154_s10, %s731_s11, %s731_s11, %s732_s18  }
  0x18   : > { %p175_p2 = scmp.lt.s32.totalorder %s729_s17, 3 }
  0x1a   : > { %p176_p3 = pnand %p533_p1, %p175_p2 }
  0x1b   : > { %s828_s19 = sand.u32 (!%p176_p3), 1, %s713_s13  }
  0x1c   : > { %179 = sbr.rel (%p176_p3) target bundleno = 187 (0xbb), region = 32  ;;  %s534_s21 = sshll.u32 (!%p176_p3), %s828_s19, 7 }
  0x1d   : > { %s182_s23 = scalar_lea.sflag (!%p176_p3), [#allocation3], %s828_s19  ;;  %s832_s29 = scalar_lea.vmem (!%p176_p3), [#allocation2], %s534_s21 }
  0x21   : > { %700 = dma.done.wait (%p801_p8), %s182_s23, 2048  }
  0x22   : > { %702 = vsyncadd (%p801_p8), %s182_s23, 4294965248  ;;  %v733_v0 = vmov 0   ;;  %v222_v1 = vld [vmem:[%s832_s29 + $0x50] sm:$0xff]  ;;  %v223_v2 = vld [vmem:[%s832_s29 + $0x58] sm:$0xff]  ;;  %vm234_vm0 = vcmask 130048   ;;  %s535_s4 = sshll.u32 %s828_s19, 5 }
  0x23   : > { %616 = vset.pattern.permute.xlu0 %v733_v0  ;;  %v214_v3 = vld [vmem:[%s832_s29 + $0x10] sm:$0xff]  ;;  %292 = vmatpush.msra.mxu2 %v222_v1  ;;  %v215_v4 = vld [vmem:[%s832_s29 + $0x18] sm:$0xff]  ;;  %v211_v5 = vld [vmem:[%s912_s1] sm:$0xf]  ;;  %vm410_vm1 = vcmask 1043456   ;;  %s550_s5 = sshll.u32 %s721_s15, 5 }
  0x24   : > { %312 = vmatpush.msra.mxu3 %v223_v2  ;;  %v227_v6 = vld [vmem:[%s832_s29 + $0x78] sm:$0xff]  ;;  %v221_v7 = vld [vmem:[%s832_s29 + $0x48] sm:$0xff]  ;;  %v226_v8 = vld [vmem:[%s832_s29 + $0x70] sm:$0xff]  ;;  %s208_s6 = scalar_lea.vmem [#allocation5], %s535_s4  ;;  %s437_s9 = scalar_lea.hbm %s914_s3, %s550_s5 }
  0x25   : > { %293 = vmatpush.msra.mxu2 %v214_v3  ;;  %v220_v9 = vld [vmem:[%s832_s29 + $0x40] sm:$0xff]  ;;  %v213_v10 = vld [vmem:[%s832_s29 + $0x8] sm:$0xff]  ;;  %v219_v11 = vld [vmem:[%s832_s29 + $0x38] sm:$0xff]  ;;  %272 = vmatpush.msra.mxu1 %v221_v7  ;;  %s439_s15 = sshll.u32 %s208_s6, 4  ;;  %s441_s10 = sshll.u32 %s437_s9, 4  ;;  %s440_s15 = int_to_ptr.vmem [resolvable:$true] %s439_s15  ;;  %s442_s10 = int_to_ptr.hbm [resolvable:$true] %s441_s10 }
  0x26   : > { %313 = vmatpush.msra.mxu3 %v215_v4  ;;  %538 = vmatmul.msk.f32.vlgmr.msra.gmra.mxu2 %vm234_vm0, %v211_v5  ;;  %v212_v12 = vld [vmem:[%s832_s29] sm:$0xff]  ;;  %v225_v13 = vld [vmem:[%s832_s29 + $0x68] sm:$0xff]  ;;  %v218_v14 = vld [vmem:[%s832_s29 + $0x30] sm:$0xff]  ;;  %s424_s11 = scalar_lea.sflag [#allocation4], %s828_s19  ;;  %s661_s18 = sshra.s32 %s442_s10, 4  ;;  %s662_s18 = int_to_ptr.hbm [resolvable:$true] %s661_s18 }
  0x27   : > { %539 = vmatmul.msk.f32.vlgmr.msra.gmra.mxu3 %vm234_vm0, %v211_v5  ;;  %372 = vmatpush.msrb.mxu2 %v226_v8  ;;  %v224_v15 = vld [vmem:[%s832_s29 + $0x60] sm:$0xff]  ;;  %v217_v16 = vld [vmem:[%s832_s29 + $0x28] sm:$0xff]  ;;  %s663_s21 = scalar_lea.hbm %s662_s18, 32  ;;  %s667_s22 = scalar_lea.hbm %s914_s3, 64 }
  0x28   : > { %392 = vmatpush.msrb.mxu3 %v227_v6  ;;  %252 = vmatpush.msra.mxu0 %v220_v9  ;;  %v228_v17 = vld [vmem:[%s913_s2] sm:$0xf]  ;;  %p664_p4 = scmp.ne.s32.totalorder %s662_s18, %s663_s21  ;;  %p668_p7 = scmp.lt.s32.totalorder %s662_s18, %s914_s3 }
  0x29   : > { %273 = vmatpush.msra.mxu1 %v213_v10  ;;  %373 = vmatpush.msrb.mxu2 %v218_v14  ;;  %v216_v18 = vld [vmem:[%s832_s29 + $0x20] sm:$0xff]  ;;  %p669_p8 = scmp.lt.s32.totalorder %s667_s22, %s663_s21 }
  0x2a   : > { %393 = vmatpush.msrb.mxu3 %v219_v11  ;;  %537 = vmatmul.msk.f32.vlgmr.msra.gmra.mxu1 %vm234_vm0, %v211_v5  ;;  %p665_p5 = pnand %p664_p4, %p805_p9 }
  0x2b   : > { %253 = vmatpush.msra.mxu0 %v212_v12  ;;  %352 = vmatpush.msrb.mxu1 %v225_v13  ;;  %p670_p10 = por %p669_p8, %p668_p7 }
  0x2c   : > { %536 = vmatmul.msk.f32.vlgmr.msra.gmra.mxu0 %vm234_vm0, %v211_v5  ;;  %231 = vperm.xlu0 %616, %v228_v17   ;;  %p666_p6 = pneg %p665_p5 }
  0x2d   : > { %332 = vmatpush.msrb.mxu0 %v224_v15  ;;  %353 = vmatpush.msrb.mxu1 %v217_v16 }
  0x2e   : > { %542 = vmatmul.msk.f32.vlgmr.msrb.gmra.mxu2 %vm234_vm0, %v211_v5  ;;  %p671_p13 = pnand %p670_p10, %p666_p6 }
  0x2f   : > { %543 = vmatmul.msk.f32.vlgmr.msrb.gmra.mxu3 %vm234_vm0, %v211_v5  ;;  %333 = vmatpush.msrb.mxu0 %v216_v18 }
  0x32   : > { %541 = vmatmul.msk.f32.vlgmr.msrb.gmra.mxu1 %vm234_vm0, %v211_v5 }
  0x34   : > { %540 = vmatmul.msk.f32.vlgmr.msrb.gmra.mxu0 %vm234_vm0, %v211_v5 }
  0x9e   : > { %v232_v19 = vpop.permute.xlu0 %231 }
  0xa7   : > { %v275_v20 = vpop.f32.mrf.mxu1 }
  0xa8   : > { %v276_v22 = vadd.f32 %v275_v20, %v232_v19 }
  0xa9   : > { %v255_v21 = vpop.f32.mrf.mxu0  ;;  %v295_v24 = vpop.f32.mrf.mxu2 }
  0xaa   : > { %v256_v23 = vadd.f32 %v255_v21, %v232_v19  ;;  %v315_v25 = vpop.f32.mrf.mxu3  ;;  %v406_v26 = vrot.slane %v276_v22, 4  ;;  %v296_v27 = vadd.f32 %v295_v24, %v232_v19 }
  0xab   : > { %v316_v28 = vadd.f32 %v315_v25, %v232_v19 }
  0xac   : > { %v411_v29 = vsel %vm410_vm1, %v256_v23, %v406_v26 }
  0xad   : > { %v407_v30 = vrot.slane %v316_v28, 4  ;;  %419 = vst [vmem:[%s208_s6] sm:$0xff] %v411_v29 }
  0xaf   : > { %v412_v31 = vsel %vm410_vm1, %v296_v27, %v407_v30  ;;  %v355_v32 = vpop.f32.mrf.mxu1 }
  0xb0   : > { %420 = vst [vmem:[%s208_s6 + $0x8] sm:$0xff] %v412_v31  ;;  %v356_v33 = vadd.f32 %v355_v32, %v232_v19 }
  0xb1   : > { %v335_v34 = vpop.f32.mrf.mxu0  ;;  %v375_v36 = vpop.f32.mrf.mxu2 }
  0xb2   : > { %v336_v35 = vadd.f32 %v335_v34, %v232_v19  ;;  %v395_v37 = vpop.f32.mrf.mxu3  ;;  %v408_v38 = vrot.slane %v356_v33, 4  ;;  %v376_v41 = vadd.f32 %v375_v36, %v232_v19 }
  0xb3   : > { %v396_v39 = vadd.f32 %v395_v37, %v232_v19 }
  0xb4   : > { %v413_v40 = vsel %vm410_vm1, %v336_v35, %v408_v38 }
  0xb5   : > { %v409_v42 = vrot.slane %v396_v39, 4  ;;  %421 = vst [vmem:[%s208_s6 + $0x10] sm:$0xff] %v413_v40 }
  0xb7   : > { %v414_v43 = vsel %vm410_vm1, %v376_v41, %v409_v42 }
  0xb8   : > { %422 = vst [vmem:[%s208_s6 + $0x18] sm:$0xff] %v414_v43 }
  0xb9   : > { %674 = shalt.err (!%p671_p13)
}
  0xba   : > { %553 = dma.vmem_to_hbm [thread:$0]  (%p805_p9), %s440_s15, 512, %s442_s10, %s424_s11  }
  0xbb PF: > { %s453_s19 = sand.u32 1, %s709_s12   ;;  %p560_p0 = pnand %p529_p12, %p812_p11 }
  0xbc   : > { %s454_s30 = scalar_lea.sflag [#allocation4], %s453_s19 }
  0xbd   : > { %p561_p1 = pneg %p560_p0 }
  0xbf   : > { %704 = dma.done.wait (%p561_p1), %s454_s30, 512  }
  0xc0   : > { %706 = vsyncadd (%p561_p1), %s454_s30, 4294966784  ;;  %s19_s17 = sadd.s32 1, %s729_s17   ;;  %s919_s12 = smov %s713_s13 }
  0xc1   : > { %p16_p2 = scmp.ge.s32.totalorder %s19_s17, 4   ;;  %s920_s13 = smov %s717_s14 }
  0xc2   : > { %s921_s14 = smov %s810_s26  ;;  %s922_s15 = smov %s725_s16 }
  0xc3   : > { %s923_s16 = smov %s925_s20  ;;  %18 = sbr.rel (!%p16_p2) target bundleno = 6 (0x6), region = 77 }
  0xc8   :  { %460 = vsyncpa [#allocation3], 1 }
  0xc9   :  { %462 = vsyncpa [#allocation3 + $0x1], 1 }
  0xca   :  { %463 = vsyncpa [#allocation4], 1 }
  0xcb   :  { %465 = vsyncpa [#allocation4 + $0x1], 1 }

</bundles_post_ra>
